<compile_context>
chip_gen: v5e
topology: v5e:2x2
jax: 0.10.0
libtpu: 0.0.40
codegen_flags: <defaults>
</compile_context>

<pallas_src>
import math

import jax
import jax.numpy as jnp
from jax.experimental import pallas as pl
from jax.experimental.pallas import tpu as pltpu


# ------------------------------ Pallas kernel --------------------------------

def _make_transition_kernel(TH, WO, C, CP):
    """Fused eval-BN + ReLU -> 2x2 avg-pool -> 1x1-conv (matmul) kernel body.

    Block layouts:
      x_ref     : (1, TH, 2, WO, 2*C)  input dtype; lanes = [even-col ch | odd-col ch]
      scale_ref : (1, 2*C) f32         folded BN scale * 1/4 (pool factor folded in)
      shift_ref : (1, 2*C) f32         folded BN shift * 1/4
      w_ref     : (C, CP)  f32         1x1-conv weight^T, Cout padded to CP (%128==0)
      o_ref     : (1, TH, WO, CP)      output dtype
    """
    flat_ok = (WO % 8 == 0)   # is (TH, WO, C) -> (TH*WO, C) a free relayout?

    def kernel(x_ref, scale_ref, shift_ref, w_ref, o_ref):
        s = scale_ref[...]                                # (1, 2C) f32
        t = shift_ref[...]                                # (1, 2C) f32
        x = x_ref[0].astype(jnp.float32)                  # (TH, 2, WO, 2C)
        y = jnp.maximum(x * s + t, 0.0)                   # BN(eval)+ReLU (+ pool 1/4)
        rows = y[:, 0] + y[:, 1]                          # pool row pair   (TH, WO, 2C)
        pooled = rows[..., :C] + rows[..., C:]            # pool col pair   (TH, WO, C)
        w = w_ref[...]                                    # (C, CP) f32
        if flat_ok:
            a = pooled.reshape(TH * WO, C)                # free: WO % 8 == 0
            out = jnp.dot(a, w, preferred_element_type=jnp.float32)
            o_ref[...] = out.reshape(1, TH, WO, CP).astype(o_ref.dtype)
        else:
            # WO % 8 != 0 (ImageNet WO = 28/14/7): flattening would force a
            # VMEM retile copy.  Do TH small row-matmuls instead; the MXU has
            # large slack (the kernel is HBM-bandwidth-bound).
            for i in range(TH):
                out_i = jnp.dot(pooled[i], w, preferred_element_type=jnp.float32)
                o_ref[0, i] = out_i.astype(o_ref.dtype)

    return kernel


def _pick_row_tile(N, HO, WO, C, CP, in_itemsize, out_itemsize, min_steps=8):
    """Pick the per-step output-row tile TH (a divisor of HO).

    Budgets the full double-buffered VMEM footprint (2x input block + 2x output
    block + weight + BN vectors) against the device's VMEM, and keeps the grid
    at >= min_steps so both v7x TensorCores get work and the BlockSpec pipeline
    can overlap DMA with compute (helps 1-TC v5e/v6e too).
    Returns (TH, footprint_bytes).
    """
    try:
        vmem_cap = pltpu.get_tpu_info().vmem_capacity_bytes
    except Exception:
        vmem_cap = 64 << 20                      # conservative (v7x per-core)
    budget = min(vmem_cap // 6, 10 << 20)        # below every scoped-VMEM default

    w_bytes = C * CP * 4 + 2 * (2 * C) * 4       # weight + scale/shift vectors

    def footprint(th):
        in_blk = th * 2 * WO * 2 * C * in_itemsize
        out_blk = th * WO * CP * out_itemsize
        return 2 * in_blk + 2 * out_blk + w_bytes

    divisors = [d for d in range(1, HO + 1) if HO % d == 0]
    fitting = [d for d in divisors if footprint(d) <= budget] or [1]
    need_row_steps = -(-min_steps // max(N, 1))  # ceil(min_steps / N)
    good = [d for d in fitting if HO // d >= need_row_steps]
    th = max(good) if good else min(fitting)     # else: maximize steps instead
    return th, footprint(th)


# ------------------------------ forward wrappers -----------------------------

def transition_forward_nhwc(x, bn_params, conv_w, eps=1e-5):
    """DenseNet Transition forward, NHWC in / NHWC out (TPU-native layout).

    x         : (N, H, W, Cin), f32 or bf16 — consumed in its own dtype
                (no host transpose / upcast passes around the kernel).
    bn_params : (gamma, beta, running_mean, running_var)   eval-mode BN
    conv_w    : (Cout, Cin) or (Cout, Cin, 1, 1)            1x1 conv, no bias
    returns   : (N, H//2, W//2, Cout) in x.dtype
    """
    gamma, beta, mean, var = (jnp.asarray(p, jnp.float32) for p in bn_params)
    w = jnp.asarray(conv_w, jnp.float32).reshape(conv_w.shape[0], conv_w.shape[1])
    Cout, Cin = w.shape
    N, H, W, C = x.shape
    assert C == Cin, (C, Cin)
    HO, WO = H // 2, W // 2
    assert HO >= 1 and WO >= 1, (H, W)

    # F.avg_pool2d(., 2) floors odd spatial dims; cropping first is equivalent
    # because BN / ReLU / 1x1-conv are all per-pixel (no-op for even H, W).
    if (H, W) != (2 * HO, 2 * WO):
        x = x[:, :2 * HO, :2 * WO, :]

    # Fold eval-mode BN into per-channel scale/shift, and fold the 2x2 avg-pool
    # factor 1/4 into them (exact: relu(a)*c == relu(a*c) for c > 0).
    inv_std = jax.lax.rsqrt(var + eps)
    scale = gamma * inv_std * 0.25
    shift = (beta - mean * gamma * inv_std) * 0.25

    # Keep input channels lane-aligned (multiple of 128).  No-op for DenseNet
    # widths (256/512/1024); other widths take one pad pass but keep the kernel
    # free of cross-lane shuffles.
    CinP = ((Cin + 127) // 128) * 128
    if CinP != Cin:
        x = jnp.pad(x, ((0, 0), (0, 0), (0, 0), (0, CinP - Cin)))
        scale = jnp.pad(scale, (0, CinP - Cin))
        shift = jnp.pad(shift, (0, CinP - Cin))
        w = jnp.pad(w, ((0, 0), (0, CinP - Cin)))

    # Lane-dense output channels (pad Cout up to a multiple of 128).
    CP = ((Cout + 127) // 128) * 128
    w_p = jnp.zeros((CinP, CP), jnp.float32).at[:, :Cout].set(jnp.transpose(w))

    # Free, row-major metadata reshape exposing the 2x2 pooling window:
    # (N, H, W, C) -> (N, HO, 2, WO, 2*C); lanes hold [even-col | odd-col] chans.
    xr = x.reshape(N, HO, 2, WO, 2 * CinP)
    scale2 = jnp.tile(scale, 2).reshape(1, 2 * CinP)
    shift2 = jnp.tile(shift, 2).reshape(1, 2 * CinP)

    out_dtype = x.dtype
    TH, fp = _pick_row_tile(N, HO, WO, CinP, CP,
                            x.dtype.itemsize, jnp.dtype(out_dtype).itemsize)
    kernel = _make_transition_kernel(TH, WO, CinP, CP)

    cp_kwargs = dict(dimension_semantics=("parallel", "parallel"))
    if fp + (4 << 20) > (16 << 20):          # would not fit v5e scoped default
        cp_kwargs["vmem_limit_bytes"] = int(min(fp + (8 << 20), 48 << 20))

    out = pl.pallas_call(
        kernel,
        out_shape=jax.ShapeDtypeStruct((N, HO, WO, CP), out_dtype),
        grid=(N, HO // TH),
        in_specs=[
            pl.BlockSpec((1, TH, 2, WO, 2 * CinP), lambda n, j: (n, j, 0, 0, 0)),
            pl.BlockSpec((1, 2 * CinP), lambda n, j: (0, 0)),
            pl.BlockSpec((1, 2 * CinP), lambda n, j: (0, 0)),
            pl.BlockSpec((CinP, CP), lambda n, j: (0, 0)),
        ],
        out_specs=pl.BlockSpec((1, TH, WO, CP), lambda n, j: (n, j, 0, 0)),
        compiler_params=pltpu.CompilerParams(**cp_kwargs),
    )(xr, scale2, shift2, w_p)

    if CP != Cout:                           # no-op for DenseNet out_planes
        out = out[..., :Cout]
    return out


def transition_forward(x_nchw, bn_params, conv_w, eps=1e-5):
    """Drop-in NCHW adapter (PyTorch layout).  Prefer transition_forward_nhwc
    inside an NHWC model: these two transposes are exactly the extra HBM passes
    the NHWC path avoids."""
    x = jnp.transpose(x_nchw, (0, 2, 3, 1))
    y = transition_forward_nhwc(x, bn_params, conv_w, eps)
    return jnp.transpose(y, (0, 3, 1, 2))


# ------------------------------ plain-JAX reference --------------------------

def transition_reference_nhwc(x, bn_params, conv_w, eps=1e-5):
    gamma, beta, mean, var = bn_params
    w = conv_w.reshape(conv_w.shape[0], -1)                     # (Cout, Cin)
    inv_std = jax.lax.rsqrt(var + eps)
    y = jnp.maximum(x.astype(jnp.float32) * (gamma * inv_std)
                    + (beta - mean * gamma * inv_std), 0.0)
    y = jnp.einsum('nhwc,oc->nhwo', y, w, precision=jax.lax.Precision.HIGHEST)
    N, H, W, Co = y.shape
    HO, WO = H // 2, W // 2
    y = y[:, :2 * HO, :2 * WO, :].reshape(N, HO, 2, WO, 2, Co).mean(axis=(2, 4))
    return y


# ----------------------------------- main -------------------------------------

if __name__ == "__main__":
    key = jax.random.PRNGKey(0)
    kx, kg, kb, km, kv, kw = jax.random.split(key, 6)

    # First ImageNet-DenseNet transition-ish shapes, kept small:
    # in_planes=256, out_planes=128 (lane-dense), 32x32 feature map, batch 2.
    N, Cin, H, W = 2, 256, 32, 32
    Cout = 128

    x_nhwc = jax.random.normal(kx, (N, H, W, Cin), jnp.float32)
    gamma = 1.0 + 0.1 * jax.random.normal(kg, (Cin,), jnp.float32)
    beta = 0.1 * jax.random.normal(kb, (Cin,), jnp.float32)
    mean = 0.1 * jax.random.normal(km, (Cin,), jnp.float32)
    var = 1.0 + 0.1 * jax.random.uniform(kv, (Cin,), jnp.float32)
    conv_w = jax.random.normal(kw, (Cout, Cin), jnp.float32) / math.sqrt(Cin)
    bn = (gamma, beta, mean, var)

    fwd = jax.jit(transition_forward_nhwc)

    # --- f32, NHWC-native path (no layout passes around the kernel) ----------
    y = fwd(x_nhwc, bn, conv_w)
    jax.block_until_ready(y)
    assert y.shape == (N, H // 2, W // 2, Cout), y.shape
    assert bool(jnp.all(jnp.isfinite(y)))
    y_ref = transition_reference_nhwc(x_nhwc, bn, conv_w)
    err = float(jnp.max(jnp.abs(y.astype(jnp.float32) - y_ref)))
    assert err < 5e-2, f"f32 max abs diff vs reference = {err}"

    # --- bf16 activations (halves the dominant HBM read + the output write) --
    x_bf16 = x_nhwc.astype(jnp.bfloat16)
    y_bf = fwd(x_bf16, bn, conv_w)
    jax.block_until_ready(y_bf)
    assert y_bf.dtype == jnp.bfloat16
    y_ref_bf = transition_reference_nhwc(x_bf16.astype(jnp.float32), bn, conv_w)
    err_bf = float(jnp.max(jnp.abs(y_bf.astype(jnp.float32) - y_ref_bf)))
    assert err_bf < 1e-1, f"bf16 max abs diff vs reference = {err_bf}"

    # --- drop-in NCHW adapter (PyTorch-layout parity) -------------------------
    x_nchw = jnp.transpose(x_nhwc, (0, 3, 1, 2))
    y_nchw = jax.jit(transition_forward)(x_nchw, bn, conv_w)
    jax.block_until_ready(y_nchw)
    assert y_nchw.shape == (N, Cout, H // 2, W // 2), y_nchw.shape
    err_nchw = float(jnp.max(jnp.abs(
        jnp.transpose(y_nchw, (0, 2, 3, 1)).astype(jnp.float32) - y_ref)))
    assert err_nchw < 5e-2, f"NCHW max abs diff vs reference = {err_nchw}"

    print("KERNEL_OK")
</pallas_src>

<mosaic_0001>
module attributes {stable_mosaic.version = 11 : i64} {
  func.func @kernel(%arg0: i32, %arg1: i32, %arg2: memref<1x4x2x16x512xf32, #tpu.memory_space<vmem>>, %arg3: memref<1x512xf32, #tpu.memory_space<vmem>>, %arg4: memref<1x512xf32, #tpu.memory_space<vmem>>, %arg5: memref<256x128xf32, #tpu.memory_space<vmem>>, %arg6: memref<1x4x16x128xf32, #tpu.memory_space<vmem>>) attributes {dimension_semantics = [#tpu.dimension_semantics<parallel>, #tpu.dimension_semantics<parallel>], iteration_bounds = array<i64: 2, 4>, scalar_prefetch = 0 : i64, scratch_operands = 0 : i64, tpu.core_type = #tpu.core_type<tc>, window_params = [{transform_indices = @transform_0, window_bounds = array<i64: 1, 4, 2, 16, 512>}, {pipeline_mode = #tpu.pipeline_mode<synchronous>, transform_indices = @transform_1, window_bounds = array<i64: 1, 512>}, {pipeline_mode = #tpu.pipeline_mode<synchronous>, transform_indices = @transform_2, window_bounds = array<i64: 1, 512>}, {pipeline_mode = #tpu.pipeline_mode<synchronous>, transform_indices = @transform_3, window_bounds = array<i64: 256, 128>}, {transform_indices = @transform_4, window_bounds = array<i64: 1, 4, 16, 128>}]} {
    %c0 = arith.constant 0 : index
    %c0_0 = arith.constant 0 : index
    %0 = vector.load %arg3[%c0, %c0_0] : memref<1x512xf32, #tpu.memory_space<vmem>>, vector<1x512xf32>
    %c0_1 = arith.constant 0 : index
    %c0_2 = arith.constant 0 : index
    %1 = vector.load %arg4[%c0_1, %c0_2] : memref<1x512xf32, #tpu.memory_space<vmem>>, vector<1x512xf32>
    %c0_3 = arith.constant 0 : index
    %c0_4 = arith.constant 0 : index
    %c0_5 = arith.constant 0 : index
    %c0_6 = arith.constant 0 : index
    %c0_7 = arith.constant 0 : index
    %2 = vector.load %arg2[%c0_3, %c0_4, %c0_5, %c0_6, %c0_7] : memref<1x4x2x16x512xf32, #tpu.memory_space<vmem>>, vector<1x4x2x16x512xf32>
    %3 = vector.shape_cast %2 : vector<1x4x2x16x512xf32> to vector<4x2x16x512xf32>
    %4 = vector.shape_cast %0 : vector<1x512xf32> to vector<1x1x1x512xf32>
    %5 = vector.broadcast %4 : vector<1x1x1x512xf32> to vector<4x2x16x512xf32>
    %6 = arith.mulf %3, %5 : vector<4x2x16x512xf32>
    %7 = vector.shape_cast %1 : vector<1x512xf32> to vector<1x1x1x512xf32>
    %8 = vector.broadcast %7 : vector<1x1x1x512xf32> to vector<4x2x16x512xf32>
    %9 = arith.addf %6, %8 : vector<4x2x16x512xf32>
    %cst = arith.constant 0.000000e+00 : f32
    %10 = vector.broadcast %cst : f32 to vector<4x2x16x512xf32>
    %11 = arith.maximumf %9, %10 : vector<4x2x16x512xf32>
    %12 = vector.extract_strided_slice %11 {offsets = [0, 0, 0, 0], sizes = [4, 1, 16, 512], strides = [1, 1, 1, 1]} : vector<4x2x16x512xf32> to vector<4x1x16x512xf32>
    %13 = vector.shape_cast %12 : vector<4x1x16x512xf32> to vector<4x16x512xf32>
    %14 = vector.extract_strided_slice %11 {offsets = [0, 1, 0, 0], sizes = [4, 1, 16, 512], strides = [1, 1, 1, 1]} : vector<4x2x16x512xf32> to vector<4x1x16x512xf32>
    %15 = vector.shape_cast %14 : vector<4x1x16x512xf32> to vector<4x16x512xf32>
    %16 = arith.addf %13, %15 : vector<4x16x512xf32>
    %17 = vector.extract_strided_slice %16 {offsets = [0, 0, 0], sizes = [4, 16, 256], strides = [1, 1, 1]} : vector<4x16x512xf32> to vector<4x16x256xf32>
    %18 = vector.extract_strided_slice %16 {offsets = [0, 0, 256], sizes = [4, 16, 256], strides = [1, 1, 1]} : vector<4x16x512xf32> to vector<4x16x256xf32>
    %19 = arith.addf %17, %18 : vector<4x16x256xf32>
    %c0_8 = arith.constant 0 : index
    %c0_9 = arith.constant 0 : index
    %20 = vector.load %arg5[%c0_8, %c0_9] : memref<256x128xf32, #tpu.memory_space<vmem>>, vector<256x128xf32>
    %21 = vector.shape_cast %19 : vector<4x16x256xf32> to vector<64x256xf32>
    %cst_10 = arith.constant dense<0.000000e+00> : vector<64x128xf32>
    %22 = tpu.matmul %21, %20, %cst_10 {dimension_numbers = #tpu.dot_dimension_numbers<[1], [0], [0], [1], [0, 0, 1, 1], [], []>} : vector<64x256xf32>, vector<256x128xf32>, vector<64x128xf32> -> vector<64x128xf32>
    %23 = vector.shape_cast %22 : vector<64x128xf32> to vector<1x4x16x128xf32>
    %c0_11 = arith.constant 0 : index
    %c0_12 = arith.constant 0 : index
    %c0_13 = arith.constant 0 : index
    %c0_14 = arith.constant 0 : index
    %24 = vector.load %arg6[%c0_11, %c0_12, %c0_13, %c0_14] : memref<1x4x16x128xf32, #tpu.memory_space<vmem>>, vector<1x4x16x128xf32>
    tpu.vector_store %arg6[%c0_11, %c0_12, %c0_13, %c0_14], %23 {strides = array<i32>} : memref<1x4x16x128xf32, #tpu.memory_space<vmem>>, vector<1x4x16x128xf32>,
    return
  }
  func.func @transform_0(%arg0: i32, %arg1: i32) -> (i32, i32, i32, i32, i32) {
    %c0_i32 = arith.constant 0 : i32
    %c0_i32_0 = arith.constant 0 : i32
    %c0_i32_1 = arith.constant 0 : i32
    %c0_i32_2 = arith.constant 0 : i32
    return %arg0, %arg1, %c0_i32, %c0_i32_0, %c0_i32_1 : i32, i32, i32, i32, i32
  }
  func.func @transform_1(%arg0: i32, %arg1: i32) -> (i32, i32) {
    %c0_i32 = arith.constant 0 : i32
    %c0_i32_0 = arith.constant 0 : i32
    %c0_i32_1 = arith.constant 0 : i32
    return %c0_i32, %c0_i32_0 : i32, i32
  }
  func.func @transform_2(%arg0: i32, %arg1: i32) -> (i32, i32) {
    %c0_i32 = arith.constant 0 : i32
    %c0_i32_0 = arith.constant 0 : i32
    %c0_i32_1 = arith.constant 0 : i32
    return %c0_i32, %c0_i32_0 : i32, i32
  }
  func.func @transform_3(%arg0: i32, %arg1: i32) -> (i32, i32) {
    %c0_i32 = arith.constant 0 : i32
    %c0_i32_0 = arith.constant 0 : i32
    %c0_i32_1 = arith.constant 0 : i32
    return %c0_i32, %c0_i32_0 : i32, i32
  }
  func.func @transform_4(%arg0: i32, %arg1: i32) -> (i32, i32, i32, i32) {
    %c0_i32 = arith.constant 0 : i32
    %c0_i32_0 = arith.constant 0 : i32
    %c0_i32_1 = arith.constant 0 : i32
    return %arg0, %arg1, %c0_i32, %c0_i32_0 : i32, i32, i32, i32
  }
}

</mosaic_0001>

<bundles_post_ra>
// kernel: transition_forward_nhwc.1
= control target key start
LH: loop header
LB: loop body
LE: loop exit
PB: predicated region body
PF: predicated region fallthrough
CT: control target
= control target key end

     0   :  { %9 = vsyncpa [#allocation3], 0  ;;  %s1477_s0 = inlined_call_operand.vmem [shape: f32[2,16,2,16,512], index: 0, kind: input, shape index: {}]   ;;  %s1478_s1 = inlined_call_operand.vmem [shape: f32[1,512], index: 1, kind: input, shape index: {}]   ;;  %s1479_s2 = inlined_call_operand.vmem [shape: f32[1,512], index: 2, kind: input, shape index: {}]   ;;  %s1480_s3 = inlined_call_operand.vmem [shape: f32[256,128], index: 3, kind: input, shape index: {}]   ;;  %s1481_s4 = inlined_call_operand.hbm [shape: f32[2,16,16,128], index: 4, kind: output, shape index: {}]  }
   0x1   :  { %11 = vsyncpa [#allocation3 + $0x1], 0  ;;  %s1026_s15 = smov 0   ;;  %s1028_s16 = smov 0  }
   0x2   :  { %s1030_s17 = smov 0   ;;  %s1032_s18 = smov 0  }
   0x3   :  { %s1034_s19 = smov 0   ;;  %s1036_s20 = smov 0  }
   0x4   :  { %s1038_s21 = smov 0   ;;  %s1040_s22 = smov 0  }
   0x5 LB: > { %s780_s23 = sadd.s32 4294967295, %s997_s22   ;;  %s781_s24 = sadd.s32 4294967294, %s997_s22   ;;  %s997_s22 = sphi %s1040_s22, %s17_s22   ;;  %s993_s21 = sphi %s1038_s21, %s1490_s21   ;;  %s989_s20 = sphi %s1036_s20, %s1489_s20   ;;  %s985_s19 = sphi %s1034_s19, %s1488_s19   ;;  %s981_s18 = sphi %s1032_s18, %s1487_s18   ;;  %s977_s17 = sphi %s1030_s17, %s1486_s17   ;;  %s973_s16 = sphi %s1028_s16, %s1485_s16   ;;  %s969_s15 = sphi %s1026_s15, %s1484_s15  }
   0x6   : > { %s26_s25 = sadd.s32 1, %s989_s20  ;;  %s29_s26 = sadd.s32 1, %s993_s21 }
   0x7   : > { %p27_p0 = scmp.ge.s32.totalorder %s26_s25, 4  ;;  %p139_p1 = scmp.ne.s32.totalorder %s977_s17, %s973_s16 }
   0x8   : > { %p140_p2 = scmp.eq.s32.totalorder %s780_s23, 7  ;;  %p145_p5 = scmp.ne.s32.totalorder %s973_s16, %s969_s15 }
   0x9   : > { %s1492_s25 = smov (%p27_p0, %s26_s25), 0  ;;  %s1494_s26 = smov (!%p27_p0, %s29_s26), %s993_s21 }
   0xa   : > { %s125_s27 = ssub.s32 %s989_s20, %s1492_s25  ;;  %p1077_p3 = por %p140_p2, %p139_p1 }
   0xb   : > { %p31_p4 = scmp.ge.s32.totalorder %s1494_s26, 2  ;;  %p146_p6 = scmp.eq.s32.totalorder %s781_s24, 7 }
   0xc   : > { %p784_p7 = scmp.ge.s32.totalorder %s997_s22, 1  ;;  %p187_p9 = scmp.lt.s32.totalorder %s997_s22, 9 }
   0xd   : > { %s1496_s26 = smov (%p31_p4, %s1494_s26), 0  ;;  %p1086_p8 = por %p146_p6, %p145_p5 }
   0xe   : > { %s124_s30 = ssub.s32 %s993_s21, %s1496_s26  ;;  %s129_s5 = sadd.s32 1, %s977_s17 }
   0xf   : > { %s126_s6 = sor.u32 %s125_s27, %s124_s30  ;;  %p188_p10 = pnand %p784_p7, %p187_p9 }
  0x10   : > { %p127_p11 = scmp.eq.s32.totalorder %s126_s6, 0  ;;  %s786_s14 = sshll.u32 (!%p188_p10), %s981_s18, 2 }
  0x11   : > { %191 = sbr.rel (%p188_p10) target bundleno = 231 (0xe7), region = 36  ;;  %p219_p12 = scmp.lt.s32.totalorder (!%p188_p10), %s985_s19, 1 }
  0x12   : > { %s1095_s7 = scalar_select %p127_p11, %s977_s17, %s129_s5  }
  0x13   : > { %p221_p13 = scmp.lt.s32.totalorder (!%p188_p10), %s786_s14, 15  ;;  %s797_s12 = sshll.u32 (!%p188_p10), %s981_s18, 3 }
  0x14   : > { %s793_s24 = sshll.u32 (!%p188_p10), %s985_s19, 5 }
  0x16   : > { %v569_v0 = vld [vmem:[%s1480_s3 + $0x78] sm:$0xff]  ;;  %v568_v2 = vld [vmem:[%s1480_s3 + $0x70] sm:$0xff]  ;;  %v567_v4 = vld [vmem:[%s1480_s3 + $0x68] sm:$0xff]  ;;  %s220_s8 = scalar_select %p219_p12, %s985_s19, 1 }
  0x17   : > { %v585_v1 = vld [vmem:[%s1480_s3 + $0xf8] sm:$0xff]  ;;  %798 = vmatpush.msra.mxu2 %v569_v0  ;;  %v584_v3 = vld [vmem:[%s1480_s3 + $0xf0] sm:$0xff]  ;;  %v583_v5 = vld [vmem:[%s1480_s3 + $0xe8] sm:$0xff]  ;;  %586 = vmatpush.msra.mxu0 %v569_v0  ;;  %s1498_s14 = smov (!%p221_p13, %s786_s14), 15 }
  0x18   : > { %814 = vmatpush.msra.mxu3 %v585_v1  ;;  %627 = vmatpush.msra.mxu1 %v585_v1  ;;  %v566_v6 = vld [vmem:[%s1480_s3 + $0x60] sm:$0xff]  ;;  %s788_s13 = sshll.u32 %s220_s8, 8  ;;  %s787_s23 = sshll.u32 %s1498_s14, 4  ;;  %v565_v8 = vld [vmem:[%s1480_s3 + $0x58] sm:$0xff]  ;;  %v564_v10 = vld [vmem:[%s1480_s3 + $0x50] sm:$0xff] }
  0x19   : > { %799 = vmatpush.msra.mxu2 %v568_v2  ;;  %v582_v7 = vld [vmem:[%s1480_s3 + $0xe0] sm:$0xff]  ;;  %587 = vmatpush.msra.mxu0 %v568_v2  ;;  %v581_v9 = vld [vmem:[%s1480_s3 + $0xd8] sm:$0xff]  ;;  %s225_s6 = sadd.s32 %s788_s13, %s787_s23  ;;  %v580_v11 = vld [vmem:[%s1480_s3 + $0xd0] sm:$0xff]  ;;  %s689_s13 = sadd.s32 %s797_s12, %s793_s24 }
  0x1a   : > { %815 = vmatpush.msra.mxu3 %v584_v3  ;;  %628 = vmatpush.msra.mxu1 %v584_v3  ;;  %s789_s9 = sshll.u32 %s225_s6, 3  ;;  %v563_v12 = vld [vmem:[%s1480_s3 + $0x48] sm:$0xff]  ;;  %v562_v14 = vld [vmem:[%s1480_s3 + $0x40] sm:$0xff]  ;;  %v561_v35 = vld [vmem:[%s1480_s3 + $0x38] sm:$0xff]  ;;  %s794_s23 = sshll.u32 %s689_s13, 3 }
  0x1b   : > { %800 = vmatpush.msra.mxu2 %v567_v4  ;;  %588 = vmatpush.msra.mxu0 %v567_v4  ;;  %s1139_s27 = scalar_lea.vmem %s1477_s0, %s789_s9  ;;  %v579_v13 = vld [vmem:[%s1480_s3 + $0xc8] sm:$0xff]  ;;  %v578_v15 = vld [vmem:[%s1480_s3 + $0xc0] sm:$0xff]  ;;  %v577_v36 = vld [vmem:[%s1480_s3 + $0xb8] sm:$0xff]  ;;  %s691_s6 = scalar_lea.hbm %s1481_s4, %s794_s23 }
  0x1c   : > { %816 = vmatpush.msra.mxu3 %v583_v5  ;;  %629 = vmatpush.msra.mxu1 %v583_v5  ;;  %v230_v16 = vld [vmem:[%s1478_s1] sm:$0xf]  ;;  %v266_v19 = vld [vmem:[%s1139_s27 + $0x110] sm:$0xff]  ;;  %v265_v26 = vld [vmem:[%s1139_s27 + $0x108] sm:$0xff]  ;;  %s694_s9 = sshll.u32 %s691_s6, 4  ;;  %s923_s24 = scalar_lea.hbm %s1481_s4, 512  ;;  %s695_s9 = int_to_ptr.hbm [resolvable:$true] %s694_s9 }
  0x1d   : > { %801 = vmatpush.msra.mxu2 %v566_v6  ;;  %589 = vmatpush.msra.mxu0 %v566_v6  ;;  %v231_v17 = vld [vmem:[%s1479_s2] sm:$0xf]  ;;  %v1161_v20 = vperm.slane %v230_v16, 0  ;;  %v1163_v21 = vperm.slane %v230_v16, 2  ;;  %v274_v23 = vld [vmem:[%s1139_s27 + $0x150] sm:$0xff]  ;;  %v1172_v27 = vperm.slane %v230_v16, 1 }
  0x1e   : > { %817 = vmatpush.msra.mxu3 %v582_v7  ;;  %630 = vmatpush.msra.mxu1 %v582_v7  ;;  %v264_v18 = vld [vmem:[%s1139_s27 + $0x100] sm:$0xff]  ;;  %v1167_v24 = vperm.slane %v231_v17, 0  ;;  %v1169_v25 = vperm.slane %v231_v17, 2  ;;  %v267_v31 = vld [vmem:[%s1139_s27 + $0x118] sm:$0xff]  ;;  %v273_v32 = vld [vmem:[%s1139_s27 + $0x148] sm:$0xff]  ;;  %v1180_v34 = vperm.slane %v230_v16, 3 }
  0x1f   : > { %802 = vmatpush.msra.mxu2 %v565_v8  ;;  %590 = vmatpush.msra.mxu0 %v565_v8  ;;  %v272_v22 = vld [vmem:[%s1139_s27 + $0x140] sm:$0xff]  ;;  %v337_v28 = vmul.f32 %v1161_v20, %v264_v18  ;;  %v339_v29 = vmul.f32 %v1163_v21, %v266_v19  ;;  %v275_v33 = vld [vmem:[%s1139_s27 + $0x158] sm:$0xff]  ;;  %v347_v37 = vmul.f32 %v1163_v21, %v274_v23  ;;  %v1191_v40 = vperm.slane %v231_v17, 1  ;;  %v560_v41 = vld [vmem:[%s1480_s3 + $0x30] sm:$0xff]  ;;  %s917_s19 = sshra.s32 %s695_s9, 4  ;;  %s918_s19 = int_to_ptr.hbm [resolvable:$true] %s917_s19 }
  0x20   : > { %818 = vmatpush.msra.mxu3 %v581_v9  ;;  %631 = vmatpush.msra.mxu1 %v581_v9  ;;  %v345_v30 = vmul.f32 %v1161_v20, %v272_v22  ;;  %v338_v38 = vmul.f32 %v1172_v27, %v265_v26  ;;  %v346_v39 = vmul.f32 %v1172_v27, %v273_v32  ;;  %v1199_v45 = vperm.slane %v231_v17, 3  ;;  %v576_v46 = vld [vmem:[%s1480_s3 + $0xb0] sm:$0xff]  ;;  %v232_v50 = vld [vmem:[%s1139_s27] sm:$0xff]  ;;  %v559_v52 = vld [vmem:[%s1480_s3 + $0x28] sm:$0xff]  ;;  %s919_s11 = scalar_lea.hbm %s918_s19, 64  ;;  %p924_p4 = scmp.lt.s32.totalorder %s918_s19, %s1481_s4 }
  0x21   : > { %803 = vmatpush.msra.mxu2 %v564_v10  ;;  %591 = vmatpush.msra.mxu0 %v564_v10  ;;  %v410_v42 = vadd.f32 %v1167_v24, %v337_v28  ;;  %v412_v43 = vadd.f32 %v1169_v25, %v339_v29  ;;  %v420_v47 = vadd.f32 %v1169_v25, %v347_v37  ;;  %v234_v51 = vld [vmem:[%s1139_s27 + $0x10] sm:$0xff]  ;;  %v575_v57 = vld [vmem:[%s1480_s3 + $0xa8] sm:$0xff]  ;;  %v240_v62 = vld [vmem:[%s1139_s27 + $0x40] sm:$0xff]  ;;  %p920_p0 = scmp.ne.s32.totalorder %s918_s19, %s919_s11  ;;  %p925_p5 = scmp.lt.s32.totalorder %s923_s24, %s919_s11 }
  0x22   : > { %819 = vmatpush.msra.mxu3 %v580_v11  ;;  %632 = vmatpush.msra.mxu1 %v580_v11  ;;  %v418_v44 = vadd.f32 %v1167_v24, %v345_v30  ;;  %v340_v48 = vmul.f32 %v1180_v34, %v267_v31  ;;  %v348_v49 = vmul.f32 %v1180_v34, %v275_v33  ;;  %v242_v63 = vld [vmem:[%s1139_s27 + $0x50] sm:$0xff]  ;;  %v558_v4 = vld [vmem:[%s1480_s3 + $0x20] sm:$0xff]  ;;  %v573_v16 = vld [vmem:[%s1480_s3 + $0x98] sm:$0xff] }
  0x23   : > { %804 = vmatpush.msra.mxu2 %v563_v12  ;;  %592 = vmatpush.msra.mxu0 %v563_v12  ;;  %v474_v53 = vmax.f32 %v410_v42, 0.0  ;;  %v476_v54 = vmax.f32 %v412_v43, 0.0  ;;  %v411_v56 = vadd.f32 %v1191_v40, %v338_v38  ;;  %v484_v58 = vmax.f32 %v420_v47, 0.0  ;;  %v574_v5 = vld [vmem:[%s1480_s3 + $0xa0] sm:$0xff]  ;;  %v241_v22 = vld [vmem:[%s1139_s27 + $0x48] sm:$0xff]  ;;  %v243_v30 = vld [vmem:[%s1139_s27 + $0x58] sm:$0xff]  ;;  %p921_p1 = pnand %p920_p0, %p1077_p3  ;;  %p926_p6 = por %p925_p5, %p924_p4 }
  0x24   : > { %820 = vmatpush.msra.mxu3 %v579_v13  ;;  %633 = vmatpush.msra.mxu1 %v579_v13  ;;  %v482_v55 = vmax.f32 %v418_v44, 0.0  ;;  %v413_v59 = vadd.f32 %v1199_v45, %v340_v48  ;;  %v419_v60 = vadd.f32 %v1191_v40, %v346_v39  ;;  %v421_v61 = vadd.f32 %v1199_v45, %v348_v49  ;;  %v233_v13 = vld [vmem:[%s1139_s27 + $0x8] sm:$0xff]  ;;  %v556_v31 = vld [vmem:[%s1480_s3 + $0x10] sm:$0xff]  ;;  %v268_v43 = vld [vmem:[%s1139_s27 + $0x120] sm:$0xff] }
  0x25   : > { %805 = vmatpush.msra.mxu2 %v562_v14  ;;  %593 = vmatpush.msra.mxu0 %v562_v14  ;;  %v475_v1 = vmax.f32 %v411_v56, 0.0  ;;  %v305_v2 = vmul.f32 %v1161_v20, %v232_v50  ;;  %v307_v3 = vmul.f32 %v1163_v21, %v234_v51  ;;  %v524_v6 = vadd.f32 %v484_v58, %v476_v54  ;;  %v235_v14 = vld [vmem:[%s1139_s27 + $0x18] sm:$0xff]  ;;  %v572_v32 = vld [vmem:[%s1480_s3 + $0x90] sm:$0xff]  ;;  %v555_v37 = vld [vmem:[%s1480_s3 + $0x8] sm:$0xff]  ;;  %p922_p2 = pneg %p921_p1 }
  0x26   : > { %821 = vmatpush.msra.mxu3 %v578_v15  ;;  %634 = vmatpush.msra.mxu1 %v578_v15  ;;  %v522_v0 = vadd.f32 %v482_v55, %v474_v53  ;;  %v477_v7 = vmax.f32 %v413_v59, 0.0  ;;  %v483_v8 = vmax.f32 %v419_v60, 0.0  ;;  %v485_v9 = vmax.f32 %v421_v61, 0.0  ;;  %v557_v15 = vld [vmem:[%s1480_s3 + $0x18] sm:$0xff]  ;;  %v571_v44 = vld [vmem:[%s1480_s3 + $0x88] sm:$0xff]  ;;  %v270_v49 = vld [vmem:[%s1139_s27 + $0x130] sm:$0xff] }
  0x27   : > { %806 = vmatpush.msra.mxu2 %v561_v35  ;;  %594 = vmatpush.msra.mxu0 %v561_v35  ;;  %v313_v10 = vmul.f32 %v1161_v20, %v240_v62  ;;  %v315_v11 = vmul.f32 %v1163_v21, %v242_v63  ;;  %v378_v12 = vadd.f32 %v1167_v24, %v305_v2  ;;  %v276_v50 = vld [vmem:[%s1139_s27 + $0x160] sm:$0xff]  ;;  %v278_v54 = vld [vmem:[%s1139_s27 + $0x170] sm:$0xff]  ;;  %v269_v55 = vld [vmem:[%s1139_s27 + $0x128] sm:$0xff]  ;;  %p927_p7 = pnand %p926_p6, %p922_p2 }
  0x28   : > { %822 = vmatpush.msra.mxu3 %v577_v36  ;;  %635 = vmatpush.msra.mxu1 %v577_v36  ;;  %v1240_v17 = vadd.f32 %v524_v6, %v522_v0  ;;  %v523_v18 = vadd.f32 %v483_v8, %v475_v1  ;;  %v525_v19 = vadd.f32 %v485_v9, %v477_v7  ;;  %v554_v56 = vld [vmem:[%s1480_s3] sm:$0xff]  ;;  %v271_v2 = vld [vmem:[%s1139_s27 + $0x138] sm:$0xff]  ;;  %v277_v6 = vld [vmem:[%s1139_s27 + $0x168] sm:$0xff] }
  0x29   : > { %807 = vmatpush.msra.mxu2 %v560_v41  ;;  %595 = vmatpush.msra.mxu0 %v560_v41  ;;  %v380_v23 = vadd.f32 %v1169_v25, %v307_v3  ;;  %v386_v26 = vadd.f32 %v1167_v24, %v313_v10  ;;  %v388_v28 = vadd.f32 %v1169_v25, %v315_v11  ;;  %v442_v29 = vmax.f32 %v378_v12, 0.0  ;;  %v279_v7 = vld [vmem:[%s1139_s27 + $0x178] sm:$0xff] }
  0x2a   : > { %823 = vmatpush.msra.mxu3 %v576_v46  ;;  %636 = vmatpush.msra.mxu1 %v576_v46  ;;  %v547_v33 = vadd.f32 %v525_v19, %v523_v18  ;;  %v306_v35 = vmul.f32 %v1172_v27, %v233_v13  ;;  %v308_v36 = vmul.f32 %v1180_v34, %v235_v14 }
  0x2b   : > { %808 = vmatpush.msra.mxu2 %v559_v52  ;;  %596 = vmatpush.msra.mxu0 %v559_v52  ;;  %v444_v38 = vmax.f32 %v380_v23, 0.0  ;;  %v450_v39 = vmax.f32 %v386_v26, 0.0  ;;  %v452_v41 = vmax.f32 %v388_v28, 0.0  ;;  %v314_v42 = vmul.f32 %v1172_v27, %v241_v22 }
  0x2c   : > { %824 = vmatpush.msra.mxu3 %v575_v57  ;;  %637 = vmatpush.msra.mxu1 %v575_v57  ;;  %v316_v46 = vmul.f32 %v1180_v34, %v243_v30  ;;  %v379_v47 = vadd.f32 %v1191_v40, %v306_v35  ;;  %v381_v48 = vadd.f32 %v1199_v45, %v308_v36  ;;  %v570_v57 = vld [vmem:[%s1480_s3 + $0x80] sm:$0xff] }
  0x2d   : > { %809 = vmatpush.msra.mxu2 %v558_v4  ;;  %597 = vmatpush.msra.mxu0 %v558_v4  ;;  %v506_v51 = vadd.f32 %v450_v39, %v442_v29  ;;  %v508_v52 = vadd.f32 %v452_v41, %v444_v38  ;;  %v387_v53 = vadd.f32 %v1191_v40, %v314_v42  ;;  %v237_v38 = vld [vmem:[%s1139_s27 + $0x28] sm:$0xff] }
  0x2e   : > { %825 = vmatpush.msra.mxu3 %v574_v5  ;;  %638 = vmatpush.msra.mxu1 %v574_v5  ;;  %v389_v58 = vadd.f32 %v1199_v45, %v316_v46  ;;  %v443_v59 = vmax.f32 %v379_v47, 0.0  ;;  %v445_v60 = vmax.f32 %v381_v48, 0.0  ;;  %v341_v61 = vmul.f32 %v1161_v20, %v268_v43 }
  0x2f   : > { %810 = vmatpush.msra.mxu2 %v557_v15  ;;  %598 = vmatpush.msra.mxu0 %v557_v15  ;;  %v538_v62 = vadd.f32 %v508_v52, %v506_v51  ;;  %v451_v63 = vmax.f32 %v387_v53, 0.0  ;;  %v343_v0 = vmul.f32 %v1163_v21, %v270_v49  ;;  %v349_v1 = vmul.f32 %v1161_v20, %v276_v50  ;;  %v239_v49 = vld [vmem:[%s1139_s27 + $0x38] sm:$0xff]  ;;  %v245_v50 = vld [vmem:[%s1139_s27 + $0x68] sm:$0xff] }
  0x30   : > { %826 = vmatpush.msra.mxu3 %v573_v16  ;;  %639 = vmatpush.msra.mxu1 %v573_v16  ;;  %v453_v3 = vmax.f32 %v389_v58, 0.0  ;;  %v351_v4 = vmul.f32 %v1163_v21, %v278_v54  ;;  %v414_v5 = vadd.f32 %v1167_v24, %v341_v61  ;;  %v342_v8 = vmul.f32 %v1172_v27, %v269_v55  ;;  %v236_v16 = vld [vmem:[%s1139_s27 + $0x20] sm:$0xff]  ;;  %v247_v54 = vld [vmem:[%s1139_s27 + $0x78] sm:$0xff] }
  0x31   : > { %811 = vmatpush.msra.mxu2 %v556_v31  ;;  %599 = vmatpush.msra.mxu0 %v556_v31  ;;  %v507_v9 = vadd.f32 %v451_v63, %v443_v59  ;;  %v416_v10 = vadd.f32 %v1169_v25, %v343_v0  ;;  %v422_v11 = vadd.f32 %v1167_v24, %v349_v1  ;;  %v244_v31 = vld [vmem:[%s1139_s27 + $0x60] sm:$0xff]  ;;  %v282_v1 = vld [vmem:[%s1139_s27 + $0x190] sm:$0xff] }
  0x32   : > { %827 = vmatpush.msra.mxu3 %v572_v32  ;;  %640 = vmatpush.msra.mxu1 %v572_v32  ;;  %v509_v12 = vadd.f32 %v453_v3, %v445_v60  ;;  %v424_v13 = vadd.f32 %v1169_v25, %v351_v4  ;;  %v478_v14 = vmax.f32 %v414_v5, 0.0  ;;  %v344_v15 = vmul.f32 %v1180_v34, %v271_v2  ;;  %v246_v32 = vld [vmem:[%s1139_s27 + $0x70] sm:$0xff]  ;;  %v280_v60 = vld [vmem:[%s1139_s27 + $0x180] sm:$0xff] }
  0x33   : > { %812 = vmatpush.msra.mxu2 %v555_v37  ;;  %600 = vmatpush.msra.mxu0 %v555_v37  ;;  %v480_v18 = vmax.f32 %v416_v10, 0.0  ;;  %v486_v19 = vmax.f32 %v422_v11, 0.0  ;;  %v350_v22 = vmul.f32 %v1172_v27, %v277_v6  ;;  %v352_v23 = vmul.f32 %v1180_v34, %v279_v7  ;;  %v288_v6 = vld [vmem:[%s1139_s27 + $0x1c0] sm:$0xff]  ;;  %v290_v10 = vld [vmem:[%s1139_s27 + $0x1d0] sm:$0xff] }
  0x34   : > { %828 = vmatpush.msra.mxu3 %v571_v44  ;;  %641 = vmatpush.msra.mxu1 %v571_v44  ;;  %v539_v26 = vadd.f32 %v509_v12, %v507_v9  ;;  %v488_v28 = vmax.f32 %v424_v13, 0.0  ;;  %v415_v29 = vadd.f32 %v1191_v40, %v342_v8  ;;  %v417_v30 = vadd.f32 %v1199_v45, %v344_v15 }
  0x35   : > { %813 = vmatpush.msra.mxu2 %v554_v56  ;;  %601 = vmatpush.msra.mxu0 %v554_v56  ;;  %v423_v35 = vadd.f32 %v1191_v40, %v350_v22  ;;  %v425_v36 = vadd.f32 %v1199_v45, %v352_v23  ;;  %v309_v37 = vmul.f32 %v1161_v20, %v236_v16  ;;  %v281_v16 = vld [vmem:[%s1139_s27 + $0x188] sm:$0xff] }
  0x36   : > { %829 = vmatpush.msra.mxu3 %v570_v57  ;;  %614 = vmatmul.f32.vlgmr.msra.gmra.mxu2 %v1240_v17  ;;  %v238_v17 = vld [vmem:[%s1139_s27 + $0x30] sm:$0xff]  ;;  %v528_v39 = vadd.f32 %v488_v28, %v480_v18  ;;  %v479_v41 = vmax.f32 %v415_v29, 0.0  ;;  %v481_v42 = vmax.f32 %v417_v30, 0.0  ;;  %v317_v47 = vmul.f32 %v1161_v20, %v244_v31  ;;  %v289_v31 = vld [vmem:[%s1139_s27 + $0x1c8] sm:$0xff] }
  0x37   : > { %655 = vmatmul.f32.vlgmr.msra.gmra.mxu3 %v547_v33  ;;  %642 = vmatpush.msra.mxu1 %v570_v57  ;;  %v526_v33 = vadd.f32 %v486_v19, %v478_v14  ;;  %v311_v43 = vmul.f32 %v1163_v21, %v238_v17  ;;  %v487_v44 = vmax.f32 %v423_v35, 0.0  ;;  %v489_v46 = vmax.f32 %v425_v36, 0.0  ;;  %v283_v17 = vld [vmem:[%s1139_s27 + $0x198] sm:$0xff] }
  0x38   : > { %602 = vmatmul.f32.vlgmr.msra.gmra.mxu0 %v538_v62  ;;  %643 = vmatmul.f32.vlgmr.msra.gmra.mxu1 %v539_v26  ;;  %v319_v48 = vmul.f32 %v1163_v21, %v246_v32  ;;  %v382_v52 = vadd.f32 %v1167_v24, %v309_v37  ;;  %v310_v55 = vmul.f32 %v1172_v27, %v237_v38  ;;  %v291_v32 = vld [vmem:[%s1139_s27 + $0x1d8] sm:$0xff] }
  0x39   : > { %v548_v51 = vadd.f32 %v528_v39, %v526_v33  ;;  %v384_v53 = vadd.f32 %v1169_v25, %v311_v43  ;;  %v527_v56 = vadd.f32 %v487_v44, %v479_v41  ;;  %v529_v57 = vadd.f32 %v489_v46, %v481_v42  ;;  %v248_v43 = vld [vmem:[%s1139_s27 + $0x80] sm:$0xff] }
  0x3a   : > { %v390_v58 = vadd.f32 %v1167_v24, %v317_v47  ;;  %v392_v59 = vadd.f32 %v1169_v25, %v319_v48  ;;  %v446_v61 = vmax.f32 %v382_v52, 0.0  ;;  %v312_v63 = vmul.f32 %v1180_v34, %v239_v49  ;;  %v250_v49 = vld [vmem:[%s1139_s27 + $0x90] sm:$0xff] }
  0x3b   : > { %v448_v62 = vmax.f32 %v384_v53, 0.0  ;;  %v318_v0 = vmul.f32 %v1172_v27, %v245_v50  ;;  %v549_v2 = vadd.f32 %v529_v57, %v527_v56  ;;  %v320_v5 = vmul.f32 %v1180_v34, %v247_v54  ;;  %v256_v54 = vld [vmem:[%s1139_s27 + $0xc0] sm:$0xff] }
  0x3c   : > { %v454_v3 = vmax.f32 %v390_v58, 0.0  ;;  %v456_v4 = vmax.f32 %v392_v59, 0.0  ;;  %v383_v7 = vadd.f32 %v1191_v40, %v310_v55  ;;  %v385_v8 = vadd.f32 %v1199_v45, %v312_v63  ;;  %v258_v55 = vld [vmem:[%s1139_s27 + $0xd0] sm:$0xff] }
  0x3d   : > { %v391_v9 = vadd.f32 %v1191_v40, %v318_v0  ;;  %v353_v11 = vmul.f32 %v1161_v20, %v280_v60  ;;  %v393_v14 = vadd.f32 %v1199_v45, %v320_v5  ;;  %v355_v15 = vmul.f32 %v1163_v21, %v282_v1  ;;  %v249_v60 = vld [vmem:[%s1139_s27 + $0x88] sm:$0xff]  ;;  %v251_v5 = vld [vmem:[%s1139_s27 + $0x98] sm:$0xff] }
  0x3e   : > { %617 = vmatmul.f32.gmra.mxu2 %v548_v51  ;;  %v510_v12 = vadd.f32 %v454_v3, %v446_v61  ;;  %v512_v13 = vadd.f32 %v456_v4, %v448_v62  ;;  %v447_v18 = vmax.f32 %v383_v7, 0.0  ;;  %v449_v19 = vmax.f32 %v385_v8, 0.0 }
  0x3f   : > { %658 = vmatmul.f32.gmra.mxu3 %v549_v2  ;;  %v455_v22 = vmax.f32 %v391_v9, 0.0  ;;  %v361_v23 = vmul.f32 %v1161_v20, %v288_v6  ;;  %v457_v28 = vmax.f32 %v393_v14, 0.0  ;;  %v363_v29 = vmul.f32 %v1163_v21, %v290_v10  ;;  %v257_v6 = vld [vmem:[%s1139_s27 + $0xc8] sm:$0xff]  ;;  %v259_v10 = vld [vmem:[%s1139_s27 + $0xd8] sm:$0xff] }
  0x40   : > { %v540_v26 = vadd.f32 %v512_v13, %v510_v12  ;;  %v426_v30 = vadd.f32 %v1167_v24, %v353_v11  ;;  %v428_v35 = vadd.f32 %v1169_v25, %v355_v15  ;;  %v354_v37 = vmul.f32 %v1172_v27, %v281_v16  ;;  %v284_v16 = vld [vmem:[%s1139_s27 + $0x1a0] sm:$0xff] }
  0x41   : > { %v511_v33 = vadd.f32 %v455_v22, %v447_v18  ;;  %v434_v36 = vadd.f32 %v1167_v24, %v361_v23  ;;  %v513_v38 = vadd.f32 %v457_v28, %v449_v19  ;;  %v436_v39 = vadd.f32 %v1169_v25, %v363_v29 }
  0x42   : > { %605 = vmatmul.f32.gmra.mxu0 %v540_v26  ;;  %v490_v41 = vmax.f32 %v426_v30, 0.0  ;;  %v356_v42 = vmul.f32 %v1180_v34, %v283_v17  ;;  %v492_v44 = vmax.f32 %v428_v35, 0.0  ;;  %v362_v47 = vmul.f32 %v1172_v27, %v289_v31  ;;  %v286_v17 = vld [vmem:[%s1139_s27 + $0x1b0] sm:$0xff]  ;;  %v292_v31 = vld [vmem:[%s1139_s27 + $0x1e0] sm:$0xff] }
  0x43   : > { %v498_v46 = vmax.f32 %v434_v36, 0.0  ;;  %v364_v48 = vmul.f32 %v1180_v34, %v291_v32  ;;  %v541_v50 = vadd.f32 %v513_v38, %v511_v33  ;;  %v500_v51 = vmax.f32 %v436_v39, 0.0  ;;  %v294_v36 = vld [vmem:[%s1139_s27 + $0x1f0] sm:$0xff] }
  0x44   : > { %v427_v52 = vadd.f32 %v1191_v40, %v354_v37  ;;  %v429_v53 = vadd.f32 %v1199_v45, %v356_v42  ;;  %v435_v57 = vadd.f32 %v1191_v40, %v362_v47  ;;  %v321_v59 = vmul.f32 %v1161_v20, %v248_v43  ;;  %v285_v43 = vld [vmem:[%s1139_s27 + $0x1a8] sm:$0xff] }
  0x45   : > { %v530_v56 = vadd.f32 %v498_v46, %v490_v41  ;;  %v437_v58 = vadd.f32 %v1199_v45, %v364_v48  ;;  %646 = vmatmul.f32.gmra.mxu1 %v541_v50  ;;  %v532_v61 = vadd.f32 %v500_v51, %v492_v44  ;;  %v323_v0 = vmul.f32 %v1163_v21, %v250_v49  ;;  %v287_v49 = vld [vmem:[%s1139_s27 + $0x1b8] sm:$0xff] }
  0x46   : > { %v491_v62 = vmax.f32 %v427_v52, 0.0  ;;  %v493_v63 = vmax.f32 %v429_v53, 0.0  ;;  %v499_v1 = vmax.f32 %v435_v57, 0.0  ;;  %v329_v3 = vmul.f32 %v1161_v20, %v256_v54  ;;  %v293_v54 = vld [vmem:[%s1139_s27 + $0x1e8] sm:$0xff] }
  0x47   : > { %v501_v2 = vmax.f32 %v437_v58, 0.0  ;;  %v331_v4 = vmul.f32 %v1163_v21, %v258_v55  ;;  %v550_v7 = vadd.f32 %v532_v61, %v530_v56  ;;  %v394_v8 = vadd.f32 %v1167_v24, %v321_v59  ;;  %v295_v55 = vld [vmem:[%s1139_s27 + $0x1f8] sm:$0xff] }
  0x48   : > { %v396_v9 = vadd.f32 %v1169_v25, %v323_v0  ;;  %v322_v11 = vmul.f32 %v1172_v27, %v249_v60  ;;  %v531_v12 = vadd.f32 %v499_v1, %v491_v62  ;;  %v402_v14 = vadd.f32 %v1167_v24, %v329_v3  ;;  %v252_v0 = vld [vmem:[%s1139_s27 + $0xa0] sm:$0xff] }
  0x49   : > { %v533_v13 = vadd.f32 %v501_v2, %v493_v63  ;;  %v404_v15 = vadd.f32 %v1169_v25, %v331_v4  ;;  %620 = vmatmul.f32.gmra.mxu2 %v550_v7  ;;  %v458_v18 = vmax.f32 %v394_v8, 0.0  ;;  %v324_v22 = vmul.f32 %v1180_v34, %v251_v5  ;;  %v254_v5 = vld [vmem:[%s1139_s27 + $0xb0] sm:$0xff] }
  0x4a   : > { %v460_v19 = vmax.f32 %v396_v9, 0.0  ;;  %v330_v23 = vmul.f32 %v1172_v27, %v257_v6  ;;  %v466_v28 = vmax.f32 %v402_v14, 0.0  ;;  %v332_v30 = vmul.f32 %v1180_v34, %v259_v10  ;;  %v260_v10 = vld [vmem:[%s1139_s27 + $0xe0] sm:$0xff] }
  0x4b   : > { %v551_v26 = vadd.f32 %v533_v13, %v531_v12  ;;  %v468_v29 = vmax.f32 %v404_v15, 0.0  ;;  %v395_v32 = vadd.f32 %v1191_v40, %v322_v11  ;;  %v397_v33 = vadd.f32 %v1199_v45, %v324_v22  ;;  %v262_v11 = vld [vmem:[%s1139_s27 + $0xf0] sm:$0xff] }
  0x4c   : > { %v403_v35 = vadd.f32 %v1191_v40, %v330_v23  ;;  %v357_v37 = vmul.f32 %v1161_v20, %v284_v16  ;;  %v514_v38 = vadd.f32 %v466_v28, %v458_v18  ;;  %v405_v41 = vadd.f32 %v1199_v45, %v332_v30  ;;  %v253_v16 = vld [vmem:[%s1139_s27 + $0xa8] sm:$0xff]  ;;  %v255_v30 = vld [vmem:[%s1139_s27 + $0xb8] sm:$0xff] }
  0x4d   : > { %661 = vmatmul.f32.gmra.mxu3 %v551_v26  ;;  %v516_v39 = vadd.f32 %v468_v29, %v460_v19  ;;  %v359_v42 = vmul.f32 %v1163_v21, %v286_v17  ;;  %v459_v44 = vmax.f32 %v395_v32, 0.0  ;;  %v461_v46 = vmax.f32 %v397_v33, 0.0 }
  0x4e   : > { %v467_v47 = vmax.f32 %v403_v35, 0.0  ;;  %v365_v48 = vmul.f32 %v1161_v20, %v292_v31  ;;  %v469_v51 = vmax.f32 %v405_v41, 0.0  ;;  %v367_v52 = vmul.f32 %v1163_v21, %v294_v36  ;;  %v261_v31 = vld [vmem:[%s1139_s27 + $0xe8] sm:$0xff]  ;;  %v263_v36 = vld [vmem:[%s1139_s27 + $0xf8] sm:$0xff]  ;;  %s215_s27 = sand.u32 1, %s973_s16  }
  0x4f   : > { %v542_v50 = vadd.f32 %v516_v39, %v514_v38  ;;  %v430_v53 = vadd.f32 %v1167_v24, %v357_v37  ;;  %v432_v57 = vadd.f32 %v1169_v25, %v359_v42  ;;  %v358_v59 = vmul.f32 %v1172_v27, %v285_v43  ;;  %s785_s8 = sshll.u32 %s215_s27, 6  ;;  %s677_s18 = scalar_lea.sflag [#allocation3], %s215_s27 }
  0x50   : > { %v515_v56 = vadd.f32 %v467_v47, %v459_v44  ;;  %v438_v58 = vadd.f32 %v1167_v24, %v365_v48  ;;  %v517_v60 = vadd.f32 %v469_v51, %v461_v46  ;;  %v440_v61 = vadd.f32 %v1169_v25, %v367_v52  ;;  %s1421_s14 = scalar_lea.vmem [#allocation2], %s785_s8 }
  0x51   : > { %608 = vmatmul.f32.gmra.mxu0 %v542_v50  ;;  %v494_v62 = vmax.f32 %v430_v53, 0.0  ;;  %v360_v63 = vmul.f32 %v1180_v34, %v287_v49  ;;  %v496_v1 = vmax.f32 %v432_v57, 0.0  ;;  %v366_v3 = vmul.f32 %v1172_v27, %v293_v54  ;;  %s692_s10 = sshll.u32 %s1421_s14, 4  ;;  %s693_s10 = int_to_ptr.vmem [resolvable:$true] %s692_s10 }
  0x52   : > { %v502_v2 = vmax.f32 %v438_v58, 0.0  ;;  %v368_v4 = vmul.f32 %v1180_v34, %v295_v55  ;;  %v543_v6 = vadd.f32 %v517_v60, %v515_v56  ;;  %v504_v7 = vmax.f32 %v440_v61, 0.0 }
  0x53   : > { %v431_v8 = vadd.f32 %v1191_v40, %v358_v59  ;;  %v433_v9 = vadd.f32 %v1199_v45, %v360_v63  ;;  %v439_v13 = vadd.f32 %v1191_v40, %v366_v3  ;;  %v325_v15 = vmul.f32 %v1161_v20, %v252_v0 }
  0x54   : > { %v534_v12 = vadd.f32 %v502_v2, %v494_v62  ;;  %v441_v14 = vadd.f32 %v1199_v45, %v368_v4  ;;  %649 = vmatmul.f32.gmra.mxu1 %v543_v6  ;;  %v536_v18 = vadd.f32 %v504_v7, %v496_v1  ;;  %v327_v23 = vmul.f32 %v1163_v21, %v254_v5 }
  0x55   : > { %v495_v19 = vmax.f32 %v431_v8, 0.0  ;;  %v497_v22 = vmax.f32 %v433_v9, 0.0  ;;  %v503_v17 = vmax.f32 %v439_v13, 0.0  ;;  %v333_v28 = vmul.f32 %v1161_v20, %v260_v10 }
  0x56   : > { %v505_v26 = vmax.f32 %v441_v14, 0.0  ;;  %v335_v29 = vmul.f32 %v1163_v21, %v262_v11  ;;  %v552_v32 = vadd.f32 %v536_v18, %v534_v12  ;;  %v398_v33 = vadd.f32 %v1167_v24, %v325_v15 }
  0x57   : > { %v400_v35 = vadd.f32 %v1169_v25, %v327_v23  ;;  %v326_v37 = vmul.f32 %v1172_v27, %v253_v16  ;;  %v535_v38 = vadd.f32 %v503_v17, %v495_v19  ;;  %v406_v41 = vadd.f32 %v1167_v24, %v333_v28 }
  0x58   : > { %v537_v39 = vadd.f32 %v505_v26, %v497_v22  ;;  %v408_v42 = vadd.f32 %v1169_v25, %v335_v29  ;;  %623 = vmatmul.f32.gmra.mxu2 %v552_v32  ;;  %v462_v20 = vmax.f32 %v398_v33, 0.0  ;;  %v328_v21 = vmul.f32 %v1180_v34, %v255_v30 }
  0x59   : > { %v464_v43 = vmax.f32 %v400_v35, 0.0  ;;  %v334_v44 = vmul.f32 %v1172_v27, %v261_v31  ;;  %v470_v47 = vmax.f32 %v406_v41, 0.0  ;;  %v336_v49 = vmul.f32 %v1180_v34, %v263_v36 }
  0x5a   : > { %v553_v46 = vadd.f32 %v537_v39, %v535_v38  ;;  %v472_v48 = vmax.f32 %v408_v42, 0.0  ;;  %v399_v50 = vadd.f32 %v1191_v40, %v326_v37  ;;  %v401_v51 = vadd.f32 %v1199_v45, %v328_v21 }
  0x5b   : > { %v407_v24 = vadd.f32 %v1191_v40, %v334_v44  ;;  %v518_v25 = vadd.f32 %v470_v47, %v462_v20  ;;  %v409_v53 = vadd.f32 %v1199_v45, %v336_v49 }
  0x5c   : > { %664 = vmatmul.f32.gmra.mxu3 %v553_v46  ;;  %v520_v52 = vadd.f32 %v472_v48, %v464_v43  ;;  %v463_v54 = vmax.f32 %v399_v50, 0.0  ;;  %v465_v27 = vmax.f32 %v401_v51, 0.0 }
  0x5d   : > { %v471_v55 = vmax.f32 %v407_v24, 0.0  ;;  %v473_v57 = vmax.f32 %v409_v53, 0.0 }
  0x5e   : > { %v544_v56 = vadd.f32 %v520_v52, %v518_v25 }
  0x5f   : > { %v519_v58 = vadd.f32 %v471_v55, %v463_v54  ;;  %v521_v34 = vadd.f32 %v473_v57, %v465_v27 }
  0x60   : > { %611 = vmatmul.f32.gmra.mxu0 %v544_v56 }
  0x61   : > { %v545_v59 = vadd.f32 %v521_v34, %v519_v58 }
  0x63   : > { %652 = vmatmul.f32.gmra.mxu1 %v545_v59 }
  0xb5   : > { %v603_v40 = vpop.f32.mrf.mxu0  ;;  %v644_v60 = vpop.f32.mrf.mxu1 }
  0xb6   : > { %v645_v61 = vadd.f32 %v644_v60, %v603_v40 }
  0xb8   : > { %668 = vst [vmem:[%s1421_s14] sm:$0xff] %v645_v61 }
  0xb9   : > { %v615_v62 = vpop.f32.mrf.mxu2 }
  0xba   : > { %v656_v63 = vpop.f32.mrf.mxu3 }
  0xbb   : > { %v657_v45 = vadd.f32 %v656_v63, %v615_v62 }
  0xbd   : > { %672 = vst [vmem:[%s1421_s14 + $0x20] sm:$0xff] %v657_v45 }
  0xbf   : > { %v606_v1 = vpop.f32.mrf.mxu0 }
  0xc1   : > { %v618_v0 = vpop.f32.mrf.mxu2 }
  0xc2   : > { %v659_v2 = vpop.f32.mrf.mxu3  ;;  %v647_v4 = vpop.f32.mrf.mxu1 }
  0xc3   : > { %v660_v3 = vadd.f32 %v659_v2, %v618_v0  ;;  %v648_v5 = vadd.f32 %v647_v4, %v606_v1 }
  0xc5   : > { %673 = vst [vmem:[%s1421_s14 + $0x28] sm:$0xff] %v660_v3 }
  0xc6   : > { %669 = vst [vmem:[%s1421_s14 + $0x8] sm:$0xff] %v648_v5 }
  0xcc   : > { %v621_v6 = vpop.f32.mrf.mxu2 }
  0xce   : > { %v609_v7 = vpop.f32.mrf.mxu0 }
  0xd0   : > { %v662_v8 = vpop.f32.mrf.mxu3 }
  0xd1   : > { %v663_v9 = vadd.f32 %v662_v8, %v621_v6  ;;  %v650_v10 = vpop.f32.mrf.mxu1 }
  0xd2   : > { %v651_v11 = vadd.f32 %v650_v10, %v609_v7 }
  0xd3   : > { %674 = vst [vmem:[%s1421_s14 + $0x30] sm:$0xff] %v663_v9 }
  0xd4   : > { %670 = vst [vmem:[%s1421_s14 + $0x10] sm:$0xff] %v651_v11 }
  0xdb   : > { %v624_v12 = vpop.f32.mrf.mxu2 }
  0xdd   : > { %v612_v13 = vpop.f32.mrf.mxu0 }
  0xdf   : > { %v665_v14 = vpop.f32.mrf.mxu3 }
  0xe0   : > { %v666_v15 = vadd.f32 %v665_v14, %v624_v12  ;;  %v653_v16 = vpop.f32.mrf.mxu1 }
  0xe1   : > { %v654_v18 = vadd.f32 %v653_v16, %v612_v13 }
  0xe2   : > { %675 = vst [vmem:[%s1421_s14 + $0x38] sm:$0xff] %v666_v15 }
  0xe3   : > { %671 = vst [vmem:[%s1421_s14 + $0x18] sm:$0xff] %v654_v18 }
  0xe4   : > { %930 = shalt.err (!%p927_p7)
}
  0xe5   : > { %s999_s27 = smov 128   ;;  %s1000_s14 = smov 8  }
  0xe6   : > { %830 = dma.vmem_to_hbm [thread:$0]  (%p1077_p3), %s693_s10, 1024, %s695_s9, %s677_s18, %s999_s27, %s999_s27, %s1000_s14  }
  0xe7 PF: > { %p836_p9 = scmp.ge.s32.totalorder %s997_s22, 2  ;;  %s709_s30 = sand.u32 1, %s969_s15  }
  0xe8   : > { %s710_s5 = scalar_lea.sflag [#allocation3], %s709_s30 }
  0xe9   : > { %p833_p10 = pnand %p836_p9, %p1086_p8 }
  0xeb   : > { %p834_p11 = pneg %p833_p10 }
  0xed   : > { %964 = dma.done.wait (%p834_p11), %s710_s5, 1024  }
  0xee   : > { %966 = vsyncadd (%p834_p11), %s710_s5, 4294966272  ;;  %s17_s22 = sadd.s32 1, %s997_s22   ;;  %s1484_s15 = smov %s973_s16 }
  0xef   : > { %p14_p12 = scmp.ge.s32.totalorder %s17_s22, 10   ;;  %s1485_s16 = smov %s977_s17 }
  0xf0   : > { %s1486_s17 = smov %s1095_s7  ;;  %s1487_s18 = smov %s989_s20 }
  0xf1   : > { %s1488_s19 = smov %s993_s21  ;;  %s1489_s20 = smov %s1492_s25 }
  0xf2   : > { %s1490_s21 = smov %s1496_s26  ;;  %16 = sbr.rel (!%p14_p12) target bundleno = 5 (0x5), region = 71 }
  0xf7   :  { %716 = vsyncpa [#allocation3], 1 }
  0xf8   :  { %718 = vsyncpa [#allocation3 + $0x1], 1 }

</bundles_post_ra>
